<compile_context>
chip_gen: v7x
topology: tpu7x:2x2x1
jax: 0.10.0
libtpu: 0.0.40
codegen_flags: <defaults>
</compile_context>

<pallas_src>
import jax
import jax.numpy as jnp
from jax.experimental import pallas as pl
from jax.experimental.pallas import tpu as pltpu

_LANE = 128                              # vreg lane width -> lane-dense last dim
_TARGET_TILE_BYTES = 4 * 1024 * 1024     # per-operand, per-pipeline-buffer tile


def _sublane_for(dtype) -> int:
    """Minimum sublane granularity: 8 (f32), 16 (bf16/f16), 32 (int8/fp8)."""
    itemsize = jnp.dtype(dtype).itemsize
    return max(8, 32 // itemsize)


def _round_up(x: int, m: int) -> int:
    return ((x + m - 1) // m) * m


def _min_float_kernel(a_ref, b_ref, o_ref):
    # min(a + a, b + b) == min(a, b) + min(a, b): exact for IEEE floats.
    m = jnp.minimum(a_ref[...], b_ref[...])
    o_ref[...] = m + m


def _min_int_kernel(a_ref, b_ref, o_ref):
    # Integer wraparound breaks the min-of-sums identity; compute directly.
    a = a_ref[...]
    b = b_ref[...]
    o_ref[...] = jnp.minimum(a + a, b + b)


def simple_min(a: jax.Array, b: jax.Array, *, min_pallas_elements: int = 65536) -> jax.Array:
    """Computes min(a + a, b + b) elementwise with a Pallas TPU kernel."""
    assert a.shape == b.shape and a.dtype == b.dtype
    orig_shape = a.shape
    dtype = a.dtype
    n = int(a.size)

    # Tiny tensors: pallas_call dispatch + reshape plumbing costs more than a
    # fused XLA elementwise op.
    if n == 0 or n < min_pallas_elements:
        return jnp.minimum(a + a, b + b)

    itemsize = jnp.dtype(dtype).itemsize
    sublane = _sublane_for(dtype)

    a_flat = a.reshape(-1)
    b_flat = b.reshape(-1)

    # Lane-dense 2D view.  Pad only to one sublane-row group when unaligned
    # (never whole tiles); aligned sizes take a zero-copy reshape.
    chunk = sublane * _LANE
    if n % _LANE == 0:
        n_padded = n
    else:
        n_padded = _round_up(n, chunk)
        pad = n_padded - n
        a_flat = jnp.pad(a_flat, (0, pad))
        b_flat = jnp.pad(b_flat, (0, pad))
    rows = n_padded // _LANE

    # Tile sizing: big tiles to amortize per-step overhead, but at least two
    # grid steps when there is enough work (v7x dual-TC sharding).
    max_tile_rows = max(
        sublane,
        (_TARGET_TILE_BYTES // (_LANE * itemsize)) // sublane * sublane,
    )
    if rows >= 2 * sublane:
        half_rows = _round_up(pl.cdiv(rows, 2), sublane)
        tile_rows = min(max_tile_rows, half_rows)
    else:
        tile_rows = _round_up(rows, sublane)
    grid = (pl.cdiv(rows, tile_rows),)

    a2d = a_flat.reshape(rows, _LANE)
    b2d = b_flat.reshape(rows, _LANE)

    tile_bytes = tile_rows * _LANE * itemsize
    # 3 operands x 2 pipeline buffers + headroom; stays <= ~32 MiB even for
    # the 4 MiB f32 tiles, under v7x's 64 MiB physical VMEM.
    vmem_limit = min(96 * 1024 * 1024, 6 * tile_bytes + 8 * 1024 * 1024)

    kernel = _min_float_kernel if jnp.issubdtype(dtype, jnp.floating) else _min_int_kernel

    out2d = pl.pallas_call(
        kernel,
        out_shape=jax.ShapeDtypeStruct((rows, _LANE), dtype),
        grid_spec=pl.GridSpec(
            grid=grid,
            in_specs=[
                pl.BlockSpec((tile_rows, _LANE), lambda i: (i, 0)),
                pl.BlockSpec((tile_rows, _LANE), lambda i: (i, 0)),
            ],
            out_specs=pl.BlockSpec((tile_rows, _LANE), lambda i: (i, 0)),
        ),
        compiler_params=pltpu.CompilerParams(
            dimension_semantics=("parallel",),
            vmem_limit_bytes=vmem_limit,
        ),
        cost_estimate=pl.CostEstimate(
            flops=2 * n,
            transcendentals=0,
            bytes_accessed=3 * n * itemsize,
        ),
    )(a2d, b2d)

    out_flat = out2d.reshape(-1)
    if n_padded != n:
        out_flat = out_flat[:n]
    return out_flat.reshape(orig_shape)


if __name__ == "__main__":
    key = jax.random.PRNGKey(0)
    ka, kb = jax.random.split(key)

    # NCHW-style input shape, matching the PyTorch test convention.
    shape = (2, 4, 16, 16)
    a = jax.random.normal(ka, shape, dtype=jnp.float32)
    b = jax.random.normal(kb, shape, dtype=jnp.float32)

    # Force the Pallas path (the small-input fallback would otherwise use
    # plain XLA for this tiny demo shape).
    out = simple_min(a, b, min_pallas_elements=0)
    jax.block_until_ready(out)

    ref = jnp.minimum(a + a, b + b)
    assert out.shape == ref.shape
    assert jnp.allclose(out, ref), "mismatch vs reference"

    # Second quick check: non-128-aligned size exercises the pad/slice tail path.
    shape2 = (2, 3, 5, 7)
    a2 = jax.random.normal(ka, shape2, dtype=jnp.float32)
    b2 = jax.random.normal(kb, shape2, dtype=jnp.float32)
    out2 = simple_min(a2, b2, min_pallas_elements=0)
    jax.block_until_ready(out2)
    assert jnp.allclose(out2, jnp.minimum(a2 + a2, b2 + b2)), "mismatch (unaligned)"

    print("KERNEL_OK")
</pallas_src>

<mosaic_0001>
module attributes {stable_mosaic.version = 11 : i64} {
  func.func @_min_float_kernel(%arg0: i32, %arg1: memref<8x128xf32, #tpu.memory_space<vmem>>, %arg2: memref<8x128xf32, #tpu.memory_space<vmem>>, %arg3: memref<8x128xf32, #tpu.memory_space<vmem>>) attributes {dimension_semantics = [#tpu.dimension_semantics<parallel>], iteration_bounds = array<i64: 2>, scalar_prefetch = 0 : i64, scratch_operands = 0 : i64, tpu.core_type = #tpu.core_type<tc>, window_params = [{transform_indices = @transform_0, window_bounds = array<i64: 8, 128>}, {transform_indices = @transform_1, window_bounds = array<i64: 8, 128>}, {transform_indices = @transform_2, window_bounds = array<i64: 8, 128>}]} {
    %c0 = arith.constant 0 : index
    %c0_0 = arith.constant 0 : index
    %0 = vector.load %arg1[%c0, %c0_0] : memref<8x128xf32, #tpu.memory_space<vmem>>, vector<8x128xf32>
    %c0_1 = arith.constant 0 : index
    %c0_2 = arith.constant 0 : index
    %1 = vector.load %arg2[%c0_1, %c0_2] : memref<8x128xf32, #tpu.memory_space<vmem>>, vector<8x128xf32>
    %2 = arith.minimumf %0, %1 : vector<8x128xf32>
    %3 = arith.addf %2, %2 : vector<8x128xf32>
    %c0_3 = arith.constant 0 : index
    %c0_4 = arith.constant 0 : index
    %4 = vector.load %arg3[%c0_3, %c0_4] : memref<8x128xf32, #tpu.memory_space<vmem>>, vector<8x128xf32>
    tpu.vector_store %arg3[%c0_3, %c0_4], %3 {strides = array<i32>} : memref<8x128xf32, #tpu.memory_space<vmem>>, vector<8x128xf32>,
    return
  }
  func.func @transform_0(%arg0: i32) -> (i32, i32) {
    %c0_i32 = arith.constant 0 : i32
    %c0_i32_0 = arith.constant 0 : i32
    return %arg0, %c0_i32 : i32, i32
  }
  func.func @transform_1(%arg0: i32) -> (i32, i32) {
    %c0_i32 = arith.constant 0 : i32
    %c0_i32_0 = arith.constant 0 : i32
    return %arg0, %c0_i32 : i32, i32
  }
  func.func @transform_2(%arg0: i32) -> (i32, i32) {
    %c0_i32 = arith.constant 0 : i32
    %c0_i32_0 = arith.constant 0 : i32
    return %arg0, %c0_i32 : i32, i32
  }
}

</mosaic_0001>

<bundles_post_ra>
// kernel: tpu_custom_call.1
= control target key start
LH: loop header
LB: loop body
LE: loop exit
PB: predicated region body
PF: predicated region fallthrough
CT: control target
= control target key end

     0   :  { %7 = vsyncpa [#allocation3], 0  ;;  %s733_s0 = inlined_call_operand.hbm [shape: f32[16,128], index: 0, kind: input, shape index: {}]   ;;  %s734_s1 = inlined_call_operand.hbm [shape: f32[16,128], index: 1, kind: input, shape index: {}]   ;;  %s735_s2 = inlined_call_operand.hbm [shape: f32[16,128], index: 2, kind: output, shape index: {}]  }
   0x1   :  { %9 = vsyncpa [#allocation3 + $0x1], 0 }
   0x2   :  { %10 = vsyncpa [#allocation6], 0 }
   0x3   :  { %12 = vsyncpa [#allocation6 + $0x1], 0 }
   0x4   :  { %13 = vsyncpa [#allocation4], 0 }
   0x5   :  { %15 = vsyncpa [#allocation4 + $0x1], 0  ;;  %s524_s9 = smov 0   ;;  %s526_s10 = smov 0  }
   0x6   :  { %s528_s11 = smov 0   ;;  %s530_s12 = smov 0  }
   0x7 LB: > { %s545_s13 = sadd.s32 4294967295, %s504_s12   ;;  %s308_s14 = sadd.s32 4294967294, %s504_s12   ;;  %s504_s12 = sphi %s530_s12, %s754_s12   ;;  %s500_s11 = sphi %s528_s11, %s753_s11   ;;  %s496_s10 = sphi %s526_s10, %s752_s10   ;;  %s492_s9 = sphi %s524_s9, %s751_s9  }
   0x8   : > { %s549_s15 = sadd.s32 1, %s504_s12   ;;  %s28_s16 = sadd.s32 1, %s500_s11 }
   0x9   : > { %s25_s17 = ssub.s32 %s504_s12, %s549_s15  ;;  %p35_p0 = scmp.ne.s32.totalorder %s500_s11, %s496_s10 }
   0xa   : > { %p26_p1 = scmp.eq.s32.totalorder %s25_s17, 0  ;;  %p36_p2 = scmp.eq.s32.totalorder %s504_s12, 0 }
   0xb   : > { %p41_p3 = scmp.ne.s32.totalorder %s496_s10, %s492_s9  ;;  %p42_p4 = scmp.eq.s32.totalorder %s545_s13, 0 }
   0xc   : > { %s561_s18 = scalar_select %p26_p1, %s500_s11, %s28_s16  }
   0xd   : > { %p563_p5 = por %p36_p2, %p35_p0  ;;  %p567_p6 = por %p42_p4, %p41_p3 }
   0xe   : > { %p91_p7 = scmp.eq.s32.totalorder %s545_s13, 1  ;;  %p97_p8 = scmp.eq.s32.totalorder %s308_s14, 1 }
   0xf   : > { %s739_s20 = scalar_select %p567_p6, 1, 0 }
  0x10   : > { %p340_p10 = scmp.lt.s32.totalorder %s504_s12, 2  ;;  %p574_p11 = por %p91_p7, %p35_p0 }
  0x11   : > { %p578_p12 = por %p97_p8, %p41_p3  ;;  %s583_s23 = sand.u32 1, %s500_s11  }
  0x12   : > { %s740_s21 = scalar_select %p574_p11, 1, 0 }
  0x13   : > { %s741_s22 = scalar_select %p578_p12, 1, 0 }
  0x14   : > { %s312_s24 = sshll.u32 %s504_s12, 7  ;;  %s311_s25 = sshll.u32 %s583_s23, 3 }
  0x15   : > { %s592_s28 = scalar_lea.hbm %s733_s0, %s312_s24  ;;  %s121_s29 = scalar_lea.vmem [#allocation2], %s311_s25 }
  0x16   : > { %s128_s30 = sshll.u32 %s121_s29, 4  ;;  %p598_p13 = pnand %p340_p10, %p563_p5  ;;  %s602_s30 = int_to_ptr.vmem [resolvable:$true] %s128_s30 }
  0x17   : > { %s118_s4 = scalar_lea.sflag [#allocation3], %s583_s23  ;;  %s374_s5 = scalar_lea.hbm %s592_s28, 128 }
  0x18   : > { %p375_p2 = scmp.ne.s32.totalorder %s592_s28, %s374_s5  ;;  %p376_p3 = pneg %p598_p13 }
  0x19   : > { %s379_s8 = scalar_lea.hbm %s733_s0, 256  ;;  %p380_p5 = scmp.lt.u32.totalorder %s592_s28, %s733_s0 }
  0x1a   : > { %p377_p4 = pnand %p376_p3, %p375_p2  ;;  %p381_p8 = scmp.lt.u32.totalorder %s379_s8, %s374_s5 }
  0x1b   : > { %p383_p9 = scmp.lt.u32.totalorder %s374_s5, %s592_s28 }
  0x1c   : > { %p378_p7 = pneg %p377_p4  ;;  %p382_p10 = por %p381_p8, %p380_p5 }
  0x1e   : > { %p384_p0 = por %p383_p9, %p382_p10 }
  0x20   : > { %p385_p1 = pnand %p384_p0, %p378_p7 }
  0x22   : > { %388 = shalt.err (!%p385_p1)
}
  0x23   : > { %s389_s17 = scalar_lea.vmem %s602_s30, 128  ;;  %s506_s19 = smov [#allocation2]  }
  0x24   : > { %p390_p2 = scmp.ne.s32.totalorder %s602_s30, %s389_s17  ;;  %s394_s26 = sshll.u32 %s506_s19, 4  ;;  %s395_s26 = int_to_ptr.vmem [resolvable:$false] %s394_s26 }
  0x25   : > { %s396_s27 = scalar_lea.vmem %s395_s26, 256  ;;  %p397_p11 = scmp.lt.s32.totalorder %s602_s30, %s395_s26 }
  0x26   : > { %p392_p4 = pnand %p390_p2, %p376_p3  ;;  %p398_p5 = scmp.lt.s32.totalorder %s396_s27, %s389_s17 }
  0x28   : > { %p393_p12 = pneg %p392_p4  ;;  %p399_p8 = por %p398_p5, %p397_p11 }
  0x2a   : > { %p400_p9 = pnand %p399_p8, %p393_p12 }
  0x2c   : > { %403 = shalt.err (!%p400_p9)
}
  0x2d   : > { %332 = dma.hbm_to_vmem [thread:$0]  (!%p598_p13), %s592_s28, 128, %s602_s30, %s118_s4  }
  0x2e   : > { %p743_p0 = scmp.lt.s32.totalorder %s504_s12, 3  ;;  %p744_p1 = scmp.ge.s32.totalorder %s504_s12, 1 }
  0x2f   : > { %s645_s7 = scalar_lea.hbm %s734_s1, %s312_s24  ;;  %s139_s8 = scalar_lea.vmem [#allocation5], %s311_s25 }
  0x30   : > { %p636_p7 = pnand %p744_p1, %p743_p0  ;;  %s146_s14 = sshll.u32 %s139_s8, 4  ;;  %s147_s14 = int_to_ptr.vmem [resolvable:$true] %s146_s14 }
  0x31   : > { %s136_s28 = scalar_lea.sflag [#allocation6], %s583_s23  ;;  %s404_s30 = scalar_lea.hbm %s645_s7, 128 }
  0x32   : > { %s745_s29 = scalar_select %p636_p7, 1, 0 }
  0x33   : > { %p405_p11 = scmp.ne.s32.totalorder %s645_s7, %s404_s30  ;;  %s409_s24 = scalar_lea.hbm %s734_s1, 256 }
  0x34   : > { %p410_p2 = scmp.lt.u32.totalorder %s645_s7, %s734_s1  ;;  %p411_p4 = scmp.lt.u32.totalorder %s409_s24, %s404_s30 }
  0x35   : > { %p407_p12 = pnand %p405_p11, %p376_p3  ;;  %p413_p8 = scmp.lt.u32.totalorder %s404_s30, %s645_s7 }
  0x36   : > { %p412_p5 = por %p411_p4, %p410_p2 }
  0x37   : > { %p408_p10 = pneg %p407_p12 }
  0x38   : > { %p414_p9 = por %p413_p8, %p412_p5 }
  0x3a   : > { %p415_p0 = pnand %p414_p9, %p408_p10 }
  0x3c   : > { %418 = shalt.err (!%p415_p0)
}
  0x3d   : > { %s419_s23 = scalar_lea.vmem %s147_s14, 128  ;;  %s507_s25 = smov [#allocation5]  }
  0x3e   : > { %p420_p1 = scmp.ne.s32.totalorder %s147_s14, %s419_s23  ;;  %s424_s26 = sshll.u32 %s507_s25, 4  ;;  %s425_s26 = int_to_ptr.vmem [resolvable:$false] %s424_s26 }
  0x3f   : > { %s426_s27 = scalar_lea.vmem %s425_s26, 256  ;;  %p427_p6 = scmp.lt.s32.totalorder %s147_s14, %s425_s26 }
  0x40   : > { %p422_p11 = pnand %p420_p1, %p376_p3  ;;  %p428_p7 = scmp.lt.s32.totalorder %s426_s27, %s419_s23 }
  0x42   : > { %p423_p12 = pneg %p422_p11  ;;  %p429_p2 = por %p428_p7, %p427_p6 }
  0x44   : > { %p430_p4 = pnand %p429_p2, %p423_p12 }
  0x46   : > { %433 = shalt.err (!%p430_p4)
}
  0x47   : > { %335 = dma.hbm_to_vmem [thread:$0]  (!%p598_p13), %s645_s7, 128, %s147_s14, %s136_s28  }
  0x48   : > { %p746_p10 = scmp.ne.s32.totalorder %s745_s29, 0 }
  0x49   : > { %s672_s5 = sand.u32 (!%p746_p10), 1, %s496_s10   ;;  %p747_p3 = scmp.ne.s32.totalorder (!%p746_p10), %s739_s20, 0 }
  0x4a   : > { %155 = sbr.rel (%p746_p10) target bundleno = 110 (0x6e), region = 28  ;;  %s316_s6 = sshll.u32 (!%p746_p10), %s672_s5, 3 }
  0x4b   : > { %s158_s8 = scalar_lea.sflag (!%p746_p10), [#allocation3], %s672_s5  ;;  %s161_s30 = scalar_lea.vmem (!%p746_p10), [#allocation2], %s316_s6 }
  0x51   : > { %479 = dma.done.wait (%p747_p3), %s158_s8, 128  }
  0x52   : > { %481 = vsyncadd (%p747_p3), %s158_s8, 4294967168  ;;  %s167_s3 = scalar_lea.sflag [#allocation6], %s672_s5  ;;  %s170_s7 = scalar_lea.vmem [#allocation5], %s316_s6 }
  0x53   : > { %483 = dma.done.wait (%p747_p3), %s167_s3, 128  }
  0x54   : > { %485 = vsyncadd (%p747_p3), %s167_s3, 4294967168  ;;  %v196_v0 = vld [vmem:[%s161_s30] sm:$0xff]  ;;  %v197_v1 = vld [vmem:[%s170_s7] sm:$0xff]  ;;  %s195_s29 = scalar_lea.vmem [#allocation7], %s316_s6  ;;  %s320_s28 = sshll.u32 %s545_s13, 7 }
  0x55   : > { %s215_s14 = sshll.u32 %s195_s29, 4  ;;  %v198_v2 = vmin.f32 %v196_v0, %v197_v1  ;;  %s691_s20 = scalar_lea.hbm %s735_s2, %s320_s28  ;;  %s686_s14 = int_to_ptr.vmem [resolvable:$true] %s215_s14 }
  0x56   : > { %s202_s24 = scalar_lea.sflag [#allocation4], %s672_s5  ;;  %s434_s17 = scalar_lea.vmem %s686_s14, 128 }
  0x57   : > { %v199_v3 = vadd.f32 %v198_v2, %v198_v2  ;;  %p435_p6 = scmp.ne.s32.totalorder %s686_s14, %s434_s17  ;;  %p748_p13 = scmp.ne.s32.totalorder %s740_s21, 0 }
  0x58   : > { %s508_s13 = smov [#allocation7]  }
  0x59   : > { %200 = vst [vmem:[%s195_s29] sm:$0xff] %v199_v3  ;;  %p436_p7 = pnand %p435_p6, %p748_p13  ;;  %s438_s19 = sshll.u32 %s508_s13, 4  ;;  %s439_s19 = int_to_ptr.vmem [resolvable:$false] %s438_s19 }
  0x5a   : > { %s440_s23 = scalar_lea.vmem %s439_s19, 256  ;;  %p441_p8 = scmp.lt.s32.totalorder %s686_s14, %s439_s19 }
  0x5b   : > { %p437_p5 = pneg %p436_p7  ;;  %p442_p9 = scmp.lt.s32.totalorder %s440_s23, %s434_s17 }
  0x5d   : > { %p443_p0 = por %p442_p9, %p441_p8 }
  0x5f   : > { %p444_p1 = pnand %p443_p0, %p437_p5 }
  0x61   : > { %447 = shalt.err (!%p444_p1)
}
  0x62   : > { %s448_s25 = scalar_lea.hbm %s691_s20, 128  ;;  %s452_s5 = scalar_lea.hbm %s735_s2, 256 }
  0x63   : > { %p449_p11 = scmp.ne.s32.totalorder %s691_s20, %s448_s25  ;;  %p453_p4 = scmp.lt.u32.totalorder %s691_s20, %s735_s2 }
  0x64   : > { %p454_p10 = scmp.lt.u32.totalorder %s452_s5, %s448_s25  ;;  %p456_p6 = scmp.lt.u32.totalorder %s448_s25, %s691_s20 }
  0x65   : > { %p450_p12 = pnand %p449_p11, %p748_p13 }
  0x66   : > { %p455_p3 = por %p454_p10, %p453_p4 }
  0x67   : > { %p451_p2 = pneg %p450_p12 }
  0x68   : > { %p457_p7 = por %p456_p6, %p455_p3 }
  0x6a   : > { %p458_p5 = pnand %p457_p7, %p451_p2 }
  0x6c   : > { %461 = shalt.err (!%p458_p5)
}
  0x6d   : > { %327 = dma.vmem_to_hbm [thread:$0]  (%p748_p13), %s686_s14, 128, %s691_s20, %s202_s24  }
  0x6e PF: > { %s227_s30 = sand.u32 1, %s492_s9   ;;  %p749_p8 = scmp.ne.s32.totalorder %s741_s22, 0 }
  0x6f   : > { %p750_p9 = scmp.ge.s32.totalorder %s504_s12, 2  ;;  %s228_s3 = scalar_lea.sflag [#allocation4], %s227_s30 }
  0x71   : > { %p337_p0 = pnand %p750_p9, %p749_p8 }
  0x73   : > { %487 = dma.done.wait (!%p337_p0), %s228_s3, 128  }
  0x74   : > { %489 = vsyncadd (!%p337_p0), %s228_s3, 4294967168  ;;  %p18_p1 = scmp.ge.s32.totalorder %s549_s15, 4   ;;  %s751_s9 = smov %s496_s10 }
  0x75   : > { %s752_s10 = smov %s500_s11  ;;  %s753_s11 = smov %s561_s18 }
  0x76   : > { %s754_s12 = smov %s549_s15  ;;  %20 = sbr.rel (!%p18_p1) target bundleno = 7 (0x7), region = 86 }
  0x7d   :  { %233 = vsyncpa [#allocation3], 1 }
  0x7e   :  { %235 = vsyncpa [#allocation3 + $0x1], 1 }
  0x7f   :  { %236 = vsyncpa [#allocation6], 1 }
  0x80   :  { %238 = vsyncpa [#allocation6 + $0x1], 1 }
  0x81   :  { %239 = vsyncpa [#allocation4], 1 }
  0x82   :  { %241 = vsyncpa [#allocation4 + $0x1], 1 }

</bundles_post_ra>
